<compile_context>
chip_gen: v5e
topology: v5e:2x2
jax: 0.10.0
libtpu: 0.0.40
codegen_flags: <defaults>
</compile_context>

<pallas_src>
import functools

import jax
import jax.numpy as jnp
from jax.scipy.special import erfinv as _jax_erfinv
from jax.experimental import pallas as pl
from jax.experimental.pallas import tpu as pltpu

_LANES = 128


def _cdiv(a, b):
    return -(-a // b)


def _round_up(a, b):
    return _cdiv(a, b) * b


def _sublane_multiple(dtype):
    # (8, 128) tiling for 4-byte dtypes, (16, 128) for 2-byte dtypes.
    return 8 if jnp.dtype(dtype).itemsize >= 4 else 16


def _erfinv_f32(x, assume_central=False):
    """Giles (2012) single-precision erfinv approximation (elementwise).

    Uses only log / sqrt / FMA / select (VPU + EUP friendly).  Matches XLA's
    f32 erfinv to ~1e-6 in the central branch; absolute error grows in the
    w >= 5 tail (x -> 1).  With assume_central=True the tail branch is
    skipped entirely (caller must guarantee |x| <~ 0.9966).
    """
    # Defensive clamp keeps the log argument strictly positive.
    w = -jnp.log(jnp.maximum((1.0 - x) * (1.0 + x), 1e-37))

    # Branch 1: w < 5  (|x| <~ 0.9966)
    w1 = w - 2.5
    p1 = 2.81022636e-08
    for c in (3.43273939e-07, -3.5233877e-06, -4.39150654e-06, 0.00021858087,
              -0.00125372503, -0.00417768164, 0.246640727, 1.50140941):
        p1 = c + p1 * w1
    if assume_central:
        return p1 * x

    # Branch 2: w >= 5  (|x| close to 1)
    w2 = jnp.sqrt(w) - 3.0
    p2 = -0.000200214257
    for c in (0.000100950558, 0.00134934322, -0.00367342844, 0.00573950773,
              -0.0076224613, 0.00943887047, 1.00167406, 2.83297682):
        p2 = c + p2 * w2

    return jnp.where(w < 5.0, p1, p2) * x


def _segment_matrix(m):
    """128x128 block-diagonal ones matrix; segment width m (m divides 128)."""
    idx = jnp.arange(_LANES)
    return (idx[:, None] // m == idx[None, :] // m).astype(jnp.float32)


def _packed_kernel(eps, m_valid, m_pad, assume_central,
                   x_ref, seg_ref, o_ref):
    """Lane-packed path: each 128-wide row holds 128 // m_pad latent vectors."""
    x = x_ref[...].astype(jnp.float32)                 # (tile, 128)
    y = jnp.maximum(_erfinv_f32(x - eps, assume_central), eps)
    y2 = y * y
    if m_valid != m_pad:
        # Lanes that are pure padding of each vector must not enter the norm.
        lane = jax.lax.broadcasted_iota(jnp.int32, (1, _LANES), 1)
        y2 = jnp.where((lane % m_pad) < m_valid, y2, 0.0)
    # Segmented sum of squares, broadcast back to every lane of its segment:
    # one small MXU matmul against a constant block-diagonal ones matrix
    # (output row i depends only on input row i, so OOB/padded rows cannot
    # contaminate valid rows).
    ssum = jnp.dot(y2, seg_ref[...], preferred_element_type=jnp.float32)
    o_ref[...] = (y * jax.lax.rsqrt(ssum)).astype(o_ref.dtype)


def _rowwise_kernel(eps, assume_central, x_ref, o_ref):
    """Fallback for M > 128: reduce along the (already lane-dense) last dim."""
    x = x_ref[...].astype(jnp.float32)                 # (tile, M)
    y = jnp.maximum(_erfinv_f32(x - eps, assume_central), eps)
    ssum = jnp.sum(y * y, axis=-1, keepdims=True)
    o_ref[...] = (y * jax.lax.rsqrt(ssum)).astype(o_ref.dtype)


def unit_vector_forward(x, *, row_tile=2048, out_dtype=None,
                        assume_central=False):
    """UnitVector('erf_normalize') forward for x of shape [batch, M]."""
    B, M = x.shape
    in_dtype = x.dtype
    out_dtype = in_dtype if out_dtype is None else jnp.dtype(out_dtype)
    # Compute is f32; use f32 eps regardless of storage dtype so bf16 inputs
    # keep the f32/PyTorch semantics.
    eps = float(jnp.finfo(jnp.float32).eps)
    mult = max(_sublane_multiple(in_dtype), _sublane_multiple(out_dtype))
    row_tile = max(1, int(row_tile))

    if M > _LANES:
        # ---------------- rowwise fallback (already lane-dense) -------------
        tgt = max(mult, min(row_tile, (1 << 20) // max(1, M * 4)))
        grid_b = max(1, _cdiv(B, tgt))
        if grid_b == 1 and B >= 2 * mult:
            grid_b = 2  # let the batch axis shard across both v7x TensorCores
        tile = B if grid_b == 1 else _round_up(_cdiv(B, grid_b), mult)
        grid_b = _cdiv(B, tile)
        return pl.pallas_call(
            functools.partial(_rowwise_kernel, eps, assume_central),
            out_shape=jax.ShapeDtypeStruct((B, M), out_dtype),
            grid=(grid_b,),
            in_specs=[pl.BlockSpec((tile, M), lambda i: (i, 0))],
            out_specs=pl.BlockSpec((tile, M), lambda i: (i, 0)),
            compiler_params=pltpu.CompilerParams(
                dimension_semantics=("parallel",)),
        )(x)

    # ---------------- lane-packed path (M <= 128) ---------------------------
    # Pad each vector's components up to the next power of two (a divisor of
    # 128) and pad the batch to a whole number of 128-lane rows.  When M
    # already divides 128 and B*M % 128 == 0 this is a zero-copy reshape.
    m_pad = 1 if M == 1 else int(pl.next_power_of_2(M))
    vecs_per_row = _LANES // m_pad
    B_pad = _round_up(B, vecs_per_row)
    needs_pad = (B_pad != B) or (m_pad != M)
    if needs_pad:
        # Padded entries are 0.0: erfinv(0 - eps) < 0 -> clamped to eps, so no
        # NaN/Inf, and padded vectors never reach the returned slice.
        x = jnp.pad(x, ((0, B_pad - B), (0, m_pad - M)))
    rows = (B_pad * m_pad) // _LANES
    x_packed = x.reshape(rows, _LANES)     # contiguous reshape -> bitcast

    # Grid/tile selection: fix the step count first, then size the tile so
    # over-coverage is < one sublane group per step (Pallas masks the
    # out-of-bounds tail of the last block).
    grid_m = max(1, _cdiv(rows, row_tile))
    if grid_m == 1 and rows >= 2 * mult:
        grid_m = 2  # keep both v7x TensorCores busy for mid-size batches
    tile = rows if grid_m == 1 else _round_up(_cdiv(rows, grid_m), mult)
    grid_m = _cdiv(rows, tile)

    seg = _segment_matrix(m_pad)
    out = pl.pallas_call(
        functools.partial(_packed_kernel, eps, M, m_pad, assume_central),
        out_shape=jax.ShapeDtypeStruct((rows, _LANES), out_dtype),
        grid=(grid_m,),
        in_specs=[pl.BlockSpec((tile, _LANES), lambda i: (i, 0)),
                  pl.BlockSpec((_LANES, _LANES), lambda i: (0, 0))],
        out_specs=pl.BlockSpec((tile, _LANES), lambda i: (i, 0)),
        compiler_params=pltpu.CompilerParams(
            dimension_semantics=("parallel",)),
    )(x_packed, seg)

    out = out.reshape(B_pad, m_pad)
    if needs_pad:
        out = out[:B, :M]
    return out


def _reference_erf_normalize(x):
    """Pure-JAX reference matching the torch 'erf_normalize' semantics."""
    eps = jnp.finfo(jnp.float32).eps
    xf = x.astype(jnp.float32)
    y = jnp.maximum(jnp.maximum(_jax_erfinv(xf - eps), 0.0), eps)
    return y / jnp.linalg.norm(y, axis=-1, keepdims=True)


if __name__ == "__main__":
    key = jax.random.PRNGKey(0)
    batch, num_objectives = 8, 4   # latent_dim == num_objectives for erf_normalize
    x = jax.random.uniform(key, (batch, num_objectives), dtype=jnp.float32)

    out = jax.block_until_ready(unit_vector_forward(x))
    assert out.shape == (batch, num_objectives)
    assert bool(jnp.all(out >= 0.0))
    assert bool(jnp.allclose(jnp.linalg.norm(out, axis=-1), 1.0, atol=1e-5))
    assert bool(jnp.allclose(out, _reference_erf_normalize(x),
                             atol=1e-4, rtol=1e-4))

    # Ragged batch: exercises the small 128-element-boundary pad, a partial
    # last block, and the forced two-step (two-TensorCore) grid split.
    x2 = jax.random.uniform(jax.random.PRNGKey(1), (520, num_objectives),
                            dtype=jnp.float32)
    out2 = jax.block_until_ready(unit_vector_forward(x2))
    assert out2.shape == (520, num_objectives)
    assert bool(jnp.allclose(out2, _reference_erf_normalize(x2),
                             atol=1e-4, rtol=1e-4))

    # M that does not divide 128 (num_objectives=3): lane-dense padded path.
    x3 = jax.random.uniform(jax.random.PRNGKey(2), (37, 3), dtype=jnp.float32)
    out3 = jax.block_until_ready(unit_vector_forward(x3))
    assert out3.shape == (37, 3)
    assert bool(jnp.allclose(jnp.linalg.norm(out3, axis=-1), 1.0, atol=1e-5))
    assert bool(jnp.allclose(out3, _reference_erf_normalize(x3),
                             atol=1e-4, rtol=1e-4))

    print("KERNEL_OK")
</pallas_src>

<mosaic_0001>
module attributes {stable_mosaic.version = 11 : i64} {
  func.func @_packed_kernel(%arg0: i32, %arg1: memref<1x128xf32, #tpu.memory_space<vmem>>, %arg2: memref<128x128xf32, #tpu.memory_space<vmem>>, %arg3: memref<1x128xf32, #tpu.memory_space<vmem>>) attributes {dimension_semantics = [#tpu.dimension_semantics<parallel>], iteration_bounds = array<i64: 1>, scalar_prefetch = 0 : i64, scratch_operands = 0 : i64, tpu.core_type = #tpu.core_type<tc>, window_params = [{transform_indices = @transform_0, window_bounds = array<i64: 1, 128>}, {pipeline_mode = #tpu.pipeline_mode<synchronous>, transform_indices = @transform_1, window_bounds = array<i64: 128, 128>}, {transform_indices = @transform_2, window_bounds = array<i64: 1, 128>}]} {
    %c0 = arith.constant 0 : index
    %c0_0 = arith.constant 0 : index
    %0 = vector.load %arg1[%c0, %c0_0] : memref<1x128xf32, #tpu.memory_space<vmem>>, vector<1x128xf32>
    %cst = arith.constant 1.1920929E-7 : f32
    %1 = vector.broadcast %cst : f32 to vector<1x128xf32>
    %2 = arith.subf %0, %1 : vector<1x128xf32>
    %cst_1 = arith.constant 1.000000e+00 : f32
    %3 = vector.broadcast %cst_1 : f32 to vector<1x128xf32>
    %4 = arith.subf %3, %2 : vector<1x128xf32>
    %cst_2 = arith.constant 1.000000e+00 : f32
    %5 = vector.broadcast %cst_2 : f32 to vector<1x128xf32>
    %6 = arith.addf %5, %2 : vector<1x128xf32>
    %7 = arith.mulf %4, %6 : vector<1x128xf32>
    %cst_3 = arith.constant 9.99999991E-38 : f32
    %8 = vector.broadcast %cst_3 : f32 to vector<1x128xf32>
    %9 = arith.maximumf %7, %8 : vector<1x128xf32>
    %10 = math.log %9 : vector<1x128xf32>
    %cst_4 = arith.constant 0.000000e+00 : f32
    %11 = vector.broadcast %cst_4 : f32 to vector<1x128xf32>
    %12 = arith.subf %11, %10 : vector<1x128xf32>
    %cst_5 = arith.constant 2.500000e+00 : f32
    %13 = vector.broadcast %cst_5 : f32 to vector<1x128xf32>
    %14 = arith.subf %12, %13 : vector<1x128xf32>
    %cst_6 = arith.constant 2.81022636E-8 : f32
    %15 = vector.broadcast %cst_6 : f32 to vector<1x128xf32>
    %16 = arith.mulf %15, %14 : vector<1x128xf32>
    %cst_7 = arith.constant 3.43273939E-7 : f32
    %17 = vector.broadcast %cst_7 : f32 to vector<1x128xf32>
    %18 = arith.addf %17, %16 : vector<1x128xf32>
    %19 = arith.mulf %18, %14 : vector<1x128xf32>
    %cst_8 = arith.constant -3.5233877E-6 : f32
    %20 = vector.broadcast %cst_8 : f32 to vector<1x128xf32>
    %21 = arith.addf %20, %19 : vector<1x128xf32>
    %22 = arith.mulf %21, %14 : vector<1x128xf32>
    %cst_9 = arith.constant -4.39150654E-6 : f32
    %23 = vector.broadcast %cst_9 : f32 to vector<1x128xf32>
    %24 = arith.addf %23, %22 : vector<1x128xf32>
    %25 = arith.mulf %24, %14 : vector<1x128xf32>
    %cst_10 = arith.constant 2.1858087E-4 : f32
    %26 = vector.broadcast %cst_10 : f32 to vector<1x128xf32>
    %27 = arith.addf %26, %25 : vector<1x128xf32>
    %28 = arith.mulf %27, %14 : vector<1x128xf32>
    %cst_11 = arith.constant -0.00125372503 : f32
    %29 = vector.broadcast %cst_11 : f32 to vector<1x128xf32>
    %30 = arith.addf %29, %28 : vector<1x128xf32>
    %31 = arith.mulf %30, %14 : vector<1x128xf32>
    %cst_12 = arith.constant -0.00417768164 : f32
    %32 = vector.broadcast %cst_12 : f32 to vector<1x128xf32>
    %33 = arith.addf %32, %31 : vector<1x128xf32>
    %34 = arith.mulf %33, %14 : vector<1x128xf32>
    %cst_13 = arith.constant 0.246640727 : f32
    %35 = vector.broadcast %cst_13 : f32 to vector<1x128xf32>
    %36 = arith.addf %35, %34 : vector<1x128xf32>
    %37 = arith.mulf %36, %14 : vector<1x128xf32>
    %cst_14 = arith.constant 1.50140941 : f32
    %38 = vector.broadcast %cst_14 : f32 to vector<1x128xf32>
    %39 = arith.addf %38, %37 : vector<1x128xf32>
    %40 = math.sqrt %12 : vector<1x128xf32>
    %cst_15 = arith.constant 3.000000e+00 : f32
    %41 = vector.broadcast %cst_15 : f32 to vector<1x128xf32>
    %42 = arith.subf %40, %41 : vector<1x128xf32>
    %cst_16 = arith.constant -2.00214257E-4 : f32
    %43 = vector.broadcast %cst_16 : f32 to vector<1x128xf32>
    %44 = arith.mulf %43, %42 : vector<1x128xf32>
    %cst_17 = arith.constant 1.00950558E-4 : f32
    %45 = vector.broadcast %cst_17 : f32 to vector<1x128xf32>
    %46 = arith.addf %45, %44 : vector<1x128xf32>
    %47 = arith.mulf %46, %42 : vector<1x128xf32>
    %cst_18 = arith.constant 0.00134934322 : f32
    %48 = vector.broadcast %cst_18 : f32 to vector<1x128xf32>
    %49 = arith.addf %48, %47 : vector<1x128xf32>
    %50 = arith.mulf %49, %42 : vector<1x128xf32>
    %cst_19 = arith.constant -0.00367342844 : f32
    %51 = vector.broadcast %cst_19 : f32 to vector<1x128xf32>
    %52 = arith.addf %51, %50 : vector<1x128xf32>
    %53 = arith.mulf %52, %42 : vector<1x128xf32>
    %cst_20 = arith.constant 0.00573950773 : f32
    %54 = vector.broadcast %cst_20 : f32 to vector<1x128xf32>
    %55 = arith.addf %54, %53 : vector<1x128xf32>
    %56 = arith.mulf %55, %42 : vector<1x128xf32>
    %cst_21 = arith.constant -0.0076224613 : f32
    %57 = vector.broadcast %cst_21 : f32 to vector<1x128xf32>
    %58 = arith.addf %57, %56 : vector<1x128xf32>
    %59 = arith.mulf %58, %42 : vector<1x128xf32>
    %cst_22 = arith.constant 0.00943887047 : f32
    %60 = vector.broadcast %cst_22 : f32 to vector<1x128xf32>
    %61 = arith.addf %60, %59 : vector<1x128xf32>
    %62 = arith.mulf %61, %42 : vector<1x128xf32>
    %cst_23 = arith.constant 1.00167406 : f32
    %63 = vector.broadcast %cst_23 : f32 to vector<1x128xf32>
    %64 = arith.addf %63, %62 : vector<1x128xf32>
    %65 = arith.mulf %64, %42 : vector<1x128xf32>
    %cst_24 = arith.constant 2.83297682 : f32
    %66 = vector.broadcast %cst_24 : f32 to vector<1x128xf32>
    %67 = arith.addf %66, %65 : vector<1x128xf32>
    %cst_25 = arith.constant 5.000000e+00 : f32
    %68 = vector.broadcast %cst_25 : f32 to vector<1x128xf32>
    %69 = arith.cmpf olt, %12, %68 : vector<1x128xf32>
    %70 = arith.select %69, %39, %67 : vector<1x128xi1>, vector<1x128xf32>
    %71 = arith.mulf %70, %2 : vector<1x128xf32>
    %cst_26 = arith.constant 1.1920929E-7 : f32
    %72 = vector.broadcast %cst_26 : f32 to vector<1x128xf32>
    %73 = arith.maximumf %71, %72 : vector<1x128xf32>
    %74 = arith.mulf %73, %73 : vector<1x128xf32>
    %c0_27 = arith.constant 0 : index
    %c0_28 = arith.constant 0 : index
    %75 = vector.load %arg2[%c0_27, %c0_28] : memref<128x128xf32, #tpu.memory_space<vmem>>, vector<128x128xf32>
    %cst_29 = arith.constant dense<0.000000e+00> : vector<1x128xf32>
    %76 = tpu.matmul %74, %75, %cst_29 {dimension_numbers = #tpu.dot_dimension_numbers<[1], [0], [0], [1], [0, 0, 1, 1], [], []>} : vector<1x128xf32>, vector<128x128xf32>, vector<1x128xf32> -> vector<1x128xf32>
    %77 = math.rsqrt %76 : vector<1x128xf32>
    %78 = arith.mulf %73, %77 : vector<1x128xf32>
    %c0_30 = arith.constant 0 : index
    %c0_31 = arith.constant 0 : index
    %79 = vector.load %arg3[%c0_30, %c0_31] : memref<1x128xf32, #tpu.memory_space<vmem>>, vector<1x128xf32>
    tpu.vector_store %arg3[%c0_30, %c0_31], %78 {strides = array<i32>} : memref<1x128xf32, #tpu.memory_space<vmem>>, vector<1x128xf32>,
    return
  }
  func.func @transform_0(%arg0: i32) -> (i32, i32) {
    %c0_i32 = arith.constant 0 : i32
    %c0_i32_0 = arith.constant 0 : i32
    return %arg0, %c0_i32 : i32, i32
  }
  func.func @transform_1(%arg0: i32) -> (i32, i32) {
    %c0_i32 = arith.constant 0 : i32
    %c0_i32_0 = arith.constant 0 : i32
    %c0_i32_1 = arith.constant 0 : i32
    return %c0_i32, %c0_i32_0 : i32, i32
  }
  func.func @transform_2(%arg0: i32) -> (i32, i32) {
    %c0_i32 = arith.constant 0 : i32
    %c0_i32_0 = arith.constant 0 : i32
    return %arg0, %c0_i32 : i32, i32
  }
}

</mosaic_0001>

<bundles_post_ra>
// kernel: tpu_custom_call.1
= control target key start
LH: loop header
LB: loop body
LE: loop exit
PB: predicated region body
PF: predicated region fallthrough
CT: control target
= control target key end

     0   :  { %7 = vsyncpa [#allocation3], 0  ;;  %s294_s0 = inlined_call_operand.hbm [shape: f32[1,128], index: 0, kind: input, shape index: {}]   ;;  %s295_s1 = inlined_call_operand.hbm [shape: f32[128,128], index: 1, kind: input, shape index: {}]   ;;  %s296_s2 = inlined_call_operand.hbm [shape: f32[1,128], index: 2, kind: output, shape index: {}]  }
   0x1   :  { %8 = vsyncpa [#allocation6], 0 }
   0x2   :  { %9 = vsyncpa [#allocation4], 0  ;;  %s15_s11 = sshll.u32 %s294_s0, 4  ;;  %s260_s12 = smov [#allocation2]   ;;  %s16_s11 = int_to_ptr.hbm [resolvable:$true] %s15_s11 }
   0x3   :  { %s17_s13 = sshll.u32 %s260_s12, 4  ;;  %s25_s16 = sshll.u32 %s295_s1, 4  ;;  %s18_s13 = int_to_ptr.vmem [resolvable:$true] %s17_s13  ;;  %s26_s16 = int_to_ptr.hbm [resolvable:$true] %s25_s16 }
   0x4   :  { %20 = dma.hbm_to_vmem [thread:$0]  %s16_s11, 16, %s18_s13, [#allocation3]  }
   0x5   :  { %s261_s17 = smov [#allocation5]   ;;  %s262_s19 = smov 128  }
   0x6   :  { %s27_s18 = sshll.u32 %s261_s17, 4  ;;  %s263_s20 = smov 8   ;;  %s28_s18 = int_to_ptr.vmem [resolvable:$true] %s27_s18 }
   0x7   :  { %33 = dma.hbm_to_vmem [thread:$0]  %s26_s16, 2048, %s28_s18, [#allocation6], %s262_s19, %s262_s19, %s263_s20  }
   0x8   :  { %254 = dma.done.wait [#allocation3], 16  }
   0x9   :  { %255 = vsyncadd [#allocation3], 4294967280 }
   0xa   :  { %256 = dma.done.wait [#allocation6], 2048  }
   0xb   :  { %257 = vsyncadd [#allocation6], 4294965248  ;;  %v117_v0 = vld [vmem:[#allocation5 + $0x78] sm:$0xff]  ;;  %v116_v1 = vld [vmem:[#allocation5 + $0x70] sm:$0xff]  ;;  %s264_s0 = smov [#allocation7]   ;;  %s157_s23 = sshll.u32 %s296_s2, 4  ;;  %s158_s23 = int_to_ptr.hbm [resolvable:$true] %s157_s23 }
   0xc   :  { %118 = vmatpush.msra.mxu0 %v117_v0  ;;  %v115_v2 = vld [vmem:[#allocation5 + $0x68] sm:$0xff]  ;;  %v114_v3 = vld [vmem:[#allocation5 + $0x60] sm:$0xff]  ;;  %v42_v4 = vld [vmem:[#allocation2] sm:$0x1]  ;;  %s155_s1 = sshll.u32 %s264_s0, 4  ;;  %s156_s1 = int_to_ptr.vmem [resolvable:$true] %s155_s1 }
   0xd   :  { %v113_v5 = vld [vmem:[#allocation5 + $0x58] sm:$0xff]  ;;  %v286_v6 = vadd.f32 -1.1920929e-07, %v42_v4  ;;  %v112_v7 = vld [vmem:[#allocation5 + $0x50] sm:$0xff]  ;;  %v111_v10 = vld [vmem:[#allocation5 + $0x48] sm:$0xff] }
   0xe   :  { %119 = vmatpush.msra.mxu0 %v116_v1  ;;  %v110_v12 = vld [vmem:[#allocation5 + $0x40] sm:$0xff]  ;;  %v109_v14 = vld [vmem:[#allocation5 + $0x38] sm:$0xff]  ;;  %v108_v15 = vld [vmem:[#allocation5 + $0x30] sm:$0xff] }
   0xf   :  { %v44_v8 = vsub.f32 1.0, %v286_v6  ;;  %v45_v9 = vadd.f32 1.0, %v286_v6  ;;  %v107_v16 = vld [vmem:[#allocation5 + $0x28] sm:$0xff]  ;;  %v106_v18 = vld [vmem:[#allocation5 + $0x20] sm:$0xff]  ;;  %v105_v20 = vld [vmem:[#allocation5 + $0x18] sm:$0xff] }
  0x10   :  { %120 = vmatpush.msra.mxu0 %v115_v2  ;;  %v104_v22 = vld [vmem:[#allocation5 + $0x10] sm:$0xff]  ;;  %v103_v24 = vld [vmem:[#allocation5 + $0x8] sm:$0xff]  ;;  %v102_v26 = vld [vmem:[#allocation5] sm:$0xff] }
  0x11   :  { %v46_v11 = vmul.f32 %v45_v9, %v44_v8 }
  0x12   :  { %121 = vmatpush.msra.mxu0 %v114_v3 }
  0x13   :  { %v47_v13 = vmax.f32 %v46_v11, 1e-37 }
  0x14   :  { %122 = vmatpush.msra.mxu0 %v113_v5 }
  0x15   :  { %176 = vlog2.f32 %v47_v13 }
  0x16   :  { %123 = vmatpush.msra.mxu0 %v112_v7 }
  0x18   :  { %124 = vmatpush.msra.mxu0 %v111_v10 }
  0x1a   :  { %125 = vmatpush.msra.mxu0 %v110_v12 }
  0x1b   :  { %v177_v17 = vpop.eup %176 }
  0x1c   :  { %126 = vmatpush.msra.mxu0 %v109_v14  ;;  %v49_v19 = vmul.f32 0.6931472, %v177_v17 }
  0x1e   :  { %127 = vmatpush.msra.mxu0 %v108_v15  ;;  %v50_v21 = vsub.f32 0.0, %v49_v19 }
  0x20   :  { %128 = vmatpush.msra.mxu0 %v107_v16  ;;  %v169_v23 = vadd.f32 -2.5, %v50_v21  ;;  %178 = vrsqrt.f32 %v50_v21  ;;  %vm75_vm0 = vcmp.eq.f32.partialorder %v50_v21, inf  ;;  %v78_v39 = vand.u32 2147483648, %v50_v21 }
  0x21   :  { %vm77_vm1 = vcmp.eq.f32.partialorder %v50_v21, 0.0  ;;  %vm97_vm2 = vcmp.lt.f32.partialorder %v50_v21, 5.0 }
  0x22   :  { %129 = vmatpush.msra.mxu0 %v106_v18  ;;  %v52_v25 = vmul.f32 2.8102264e-08, %v169_v23 }
  0x24   :  { %130 = vmatpush.msra.mxu0 %v105_v20  ;;  %v53_v27 = vadd.f32 3.4327394e-07, %v52_v25 }
  0x26   :  { %131 = vmatpush.msra.mxu0 %v104_v22  ;;  %v179_v28 = vpop.eup %178  ;;  %v54_v29 = vmul.f32 %v169_v23, %v53_v27 }
  0x27   :  { %v69_v30 = vmul.f32 %v179_v28, %v50_v21 }
  0x28   :  { %132 = vmatpush.msra.mxu0 %v103_v24  ;;  %v55_v31 = vadd.f32 -3.5233877e-06, %v54_v29 }
  0x29   :  { %v70_v32 = vmul.f32 %v179_v28, %v69_v30 }
  0x2a   :  { %133 = vmatpush.msra.mxu0 %v102_v26  ;;  %v56_v33 = vmul.f32 %v169_v23, %v55_v31 }
  0x2b   :  { %v71_v34 = vmul.f32 0.5, %v70_v32 }
  0x2c   :  { %v57_v35 = vadd.f32 -4.3915065e-06, %v56_v33 }
  0x2d   :  { %v72_v36 = vsub.f32 1.5, %v71_v34 }
  0x2e   :  { %v58_v37 = vmul.f32 %v169_v23, %v57_v35 }
  0x2f   :  { %v73_v38 = vmul.f32 %v179_v28, %v72_v36 }
  0x30   :  { %v59_v41 = vadd.f32 0.00021858087, %v58_v37 }
  0x31   :  { %v74_v40 = vmul.f32 %v73_v38, %v50_v21 }
  0x32   :  { %v60_v45 = vmul.f32 %v169_v23, %v59_v41 }
  0x33   :  { %v76_v42 = vsel %vm75_vm0, %v50_v21, %v74_v40 }
  0x34   :  { %v79_v43 = vsel %vm77_vm1, %v78_v39, %v76_v42  ;;  %v61_v48 = vadd.f32 -0.001253725, %v60_v45 }
  0x35   :  { %v170_v44 = vadd.f32 -3.0, %v79_v43 }
  0x36   :  { %v62_v51 = vmul.f32 %v169_v23, %v61_v48 }
  0x37   :  { %v81_v46 = vmul.f32 -0.00020021426, %v170_v44 }
  0x38   :  { %v63_v54 = vadd.f32 -0.0041776816, %v62_v51 }
  0x39   :  { %v82_v47 = vadd.f32 0.00010095056, %v81_v46 }
  0x3a   :  { %v64_v57 = vmul.f32 %v169_v23, %v63_v54 }
  0x3b   :  { %v83_v49 = vmul.f32 %v170_v44, %v82_v47 }
  0x3c   :  { %v65_v60 = vadd.f32 0.24664073, %v64_v57 }
  0x3d   :  { %v84_v50 = vadd.f32 0.0013493432, %v83_v49 }
  0x3e   :  { %v66_v63 = vmul.f32 %v169_v23, %v65_v60 }
  0x3f   :  { %v85_v52 = vmul.f32 %v170_v44, %v84_v50 }
  0x40   :  { %v67_v2 = vadd.f32 1.5014094, %v66_v63 }
  0x41   :  { %v86_v53 = vadd.f32 -0.0036734284, %v85_v52 }
  0x43   :  { %v87_v55 = vmul.f32 %v170_v44, %v86_v53 }
  0x45   :  { %v88_v56 = vadd.f32 0.0057395077, %v87_v55 }
  0x47   :  { %v89_v58 = vmul.f32 %v170_v44, %v88_v56 }
  0x49   :  { %v90_v59 = vadd.f32 -0.0076224613, %v89_v58 }
  0x4b   :  { %v91_v61 = vmul.f32 %v170_v44, %v90_v59 }
  0x4d   :  { %v92_v62 = vadd.f32 0.0094388705, %v91_v61 }
  0x4f   :  { %v93_v0 = vmul.f32 %v170_v44, %v92_v62 }
  0x51   :  { %v94_v1 = vadd.f32 1.001674, %v93_v0 }
  0x53   :  { %v95_v3 = vmul.f32 %v170_v44, %v94_v1 }
  0x55   :  { %v96_v4 = vadd.f32 2.8329768, %v95_v3 }
  0x57   :  { %v98_v5 = vsel %vm97_vm2, %v67_v2, %v96_v4 }
  0x58   :  { %v99_v7 = vmul.f32 %v286_v6, %v98_v5 }
  0x5a   :  { %v100_v8 = vmax.f32 %v99_v7, 1.1920929e-07 }
  0x5c   :  { %v101_v9 = vmul.f32 %v100_v8, %v100_v8 }
  0x5e   :  { %134 = vmatmul.f32.vlgmr.msra.gmra.mxu0 %v101_v9 }
  0xdb   :  { %v135_v10 = vpop.f32.mrf.mxu0 }
  0xdc   :  { %180 = vrsqrt.f32 %v135_v10  ;;  %vm144_vm4 = vweird.f32 %v135_v10 }
  0xe2   :  { %v181_v11 = vpop.eup %180 }
  0xe3   :  { %v139_v12 = vmul.f32 %v181_v11, %v135_v10  ;;  %vm145_vm3 = vweird.f32 %v181_v11 }
  0xe4   :  { %vm146_vm5 = vmor %vm144_vm4, %vm145_vm3 }
  0xe5   :  { %v140_v13 = vmul.f32 %v181_v11, %v139_v12 }
  0xe7   :  { %v141_v14 = vmul.f32 0.5, %v140_v13 }
  0xe9   :  { %v142_v15 = vsub.f32 1.5, %v141_v14 }
  0xeb   :  { %v143_v16 = vmul.f32 %v181_v11, %v142_v15 }
  0xed   :  { %v147_v6 = vsel %vm146_vm5, %v181_v11, %v143_v16 }
  0xee   :  { %v148_v17 = vmul.f32 %v147_v6, %v100_v8 }
  0xf0   :  { %149 = vst [vmem:[#allocation7] sm:$0x1] %v148_v17 }
  0xf1   :  { %160 = dma.vmem_to_hbm [thread:$0]  %s156_s1, 16, %s158_s23, [#allocation4]  }
  0xf2   :  { %258 = dma.done.wait [#allocation4], 16  }
  0xf3   :  { %259 = vsyncadd [#allocation4], 4294967280 }
  0xf4   :  { %165 = vsyncpa [#allocation3], 1 }
  0xf5   :  { %166 = vsyncpa [#allocation6], 1 }
  0xf6   :  { %167 = vsyncpa [#allocation4], 1 }

</bundles_post_ra>
